<compile_context>
chip_gen: v5e
topology: v5e:2x2
jax: 0.10.0
libtpu: 0.0.40
codegen_flags: <defaults>
</compile_context>

<pallas_src>
import jax
import jax.numpy as jnp
from jax.experimental import pallas as pl
from jax.experimental.pallas import tpu as pltpu


_SQRT_2_OVER_PI = 0.7978845608028654  # sqrt(2/pi)


def _ffn_kernel(x_ref, w1_ref, b1_ref, w2_ref, b2_ref, o_ref, acc_ref):
    # x_ref:  (tm, E)     w1_ref: (E, th)   b1_ref: (1, th)
    # w2_ref: (th, E)     b2_ref: (1, E)    o_ref:  (tm, E)   acc_ref: (tm, E) f32
    h_idx = pl.program_id(1)

    @pl.when(h_idx == 0)
    def _init():
        acc_ref[...] = jnp.zeros_like(acc_ref)

    x = x_ref[...]
    w1 = w1_ref[...]
    if x.dtype != w1.dtype:
        # Keep matmul1 on the fast (e.g. bf16) MXU path when weights are narrower.
        x = x.astype(w1.dtype)

    # proj1 partial: (tm, E) @ (E, th) + b1[hblk]  -> f32
    h = jnp.dot(x, w1, preferred_element_type=jnp.float32)
    h = h + b1_ref[...].astype(jnp.float32)

    # GELU, tanh approximation (matches nn.GELU(approximate='tanh'))
    g = 0.5 * h * (1.0 + jnp.tanh(_SQRT_2_OVER_PI * (h + 0.044715 * h * h * h)))

    # proj2 partial: accumulate (tm, th) @ (th, E) into the f32 scratch.
    acc_ref[...] += jnp.dot(g.astype(w2_ref.dtype), w2_ref[...],
                            preferred_element_type=jnp.float32)

    @pl.when(h_idx == pl.num_programs(1) - 1)
    def _finalize():
        o_ref[...] = (acc_ref[...] + b2_ref[...].astype(jnp.float32)).astype(o_ref.dtype)


def _round_up(x, m):
    return (x + m - 1) // m * m


def _pick_hidden_tile(H, target):
    """Largest lane-aligned (multiple of 128) block <= target that divides H exactly.

    H is the contraction dim of matmul2, so a ragged hidden block would corrupt the
    accumulator; the block must divide H.
    """
    if H <= target:
        return H
    for cand in range(min(target, H), 127, -128):
        if H % cand == 0:
            return cand
    return H  # no clean lane-aligned divisor: keep H resident


def _chip_vmem_bytes():
    """Physical VMEM capacity for the current chip, with a conservative fallback."""
    try:
        cap = int(pltpu.get_tpu_info().vmem_capacity_bytes)
        if cap > 0:
            return cap
    except Exception:
        pass
    return 64 << 20  # conservative: v7x per-TC VMEM


def _weight_spec(shape, index_map, bufs):
    if bufs > 2:
        try:
            return pl.BlockSpec(shape, index_map, pipeline_mode=pl.Buffered(bufs))
        except TypeError:
            pass
    return pl.BlockSpec(shape, index_map)


def transformer_feed_forward(x, w1, b1, w2, b2, *, tm=None, th=None):
    """x: (B, S, E); w1: (E, H); b1: (H,); w2: (H, E); b2: (E,).  H = 4*E typically."""
    B, S, E = x.shape
    E_in, H = w1.shape
    assert E_in == E and w2.shape == (H, E) and b1.shape == (H,) and b2.shape == (E,)
    M = B * S

    vmem_cap = _chip_vmem_bytes()
    big_vmem = vmem_cap >= (96 << 20)  # v5e / v6e (128 MiB) vs v7x (64 MiB per TC)

    # Chip-aware tile defaults (see header comment for the roofline reasoning).
    if tm is None:
        tm = 768 if big_vmem else 512
    if th is None:
        th = 1024 if big_vmem else 512

    # Row tile: MXU/sublane aligned, never bigger than the (sublane-rounded) problem.
    tm = max(8, min(_round_up(tm, 8), _round_up(M, 8)))
    # Keep >= 2 row tiles for large M so the "parallel" axis can split across the two
    # TensorCores on v7x (harmless elsewhere).
    if M > 512 and pl.cdiv(M, tm) < 2:
        tm = max(8, _round_up(pl.cdiv(M, 2), 8))

    # Hidden tile: stream W1/W2 over H in lane-aligned blocks that divide H exactly.
    th = _pick_hidden_tile(H, th)
    n_h = H // th
    # Ragged last row tile is handled by Pallas (masked store); no host-side pad/slice.
    n_m = pl.cdiv(M, tm)

    x2 = x.reshape(M, E)
    b1_2 = b1.reshape(1, H)
    b2_2 = b2.reshape(1, E)

    act_bytes = jnp.dtype(x.dtype).itemsize
    w_bytes = jnp.dtype(w1.dtype).itemsize

    # Weight-tile buffering depth: 3 on large-VMEM chips when there are enough grid
    # steps to benefit, otherwise the default double-buffering.
    def vmem_need_for(w_bufs):
        return (w_bufs * (E * th + th * E) * w_bytes   # W1/W2 tiles, w_bufs-deep
                + 2 * 2 * tm * E * act_bytes           # x in + out tiles, double-buffered
                + tm * E * 4                           # f32 accumulator scratch
                + 2 * w_bufs * (th + E) * w_bytes)     # bias tiles

    w_bufs = 3 if (big_vmem and n_m * n_h >= 3) else 2
    if vmem_need_for(w_bufs) * 5 // 4 > vmem_cap:
        w_bufs = 2
    vmem_need = vmem_need_for(w_bufs)

    # Clamp the scoped-VMEM request to the chip's physical capacity (minus headroom
    # for internal scratch); 100 MiB-style caps are invalid on v7x.
    vmem_limit = int(min(max(vmem_need * 3 // 2, 32 << 20), vmem_cap - (4 << 20)))

    cost = pl.CostEstimate(
        flops=4 * M * E * H,                        # two matmuls: 2*M*E*H each
        transcendentals=M * H,                      # tanh per hidden activation
        bytes_accessed=(2 * M * E * act_bytes       # x in + y out
                        + 2 * E * H * w_bytes * n_m # W1 + W2 re-streamed per row tile
                        + (H + E) * w_bytes),       # biases
    )

    w1_spec = _weight_spec((E, th), lambda i, h: (0, h), w_bufs)
    w2_spec = _weight_spec((th, E), lambda i, h: (h, 0), w_bufs)

    out2 = pl.pallas_call(
        _ffn_kernel,
        out_shape=jax.ShapeDtypeStruct((M, E), x.dtype),
        grid_spec=pltpu.PrefetchScalarGridSpec(
            num_scalar_prefetch=0,
            grid=(n_m, n_h),
            in_specs=[
                pl.BlockSpec((tm, E), lambda i, h: (i, 0)),   # x rows (reused over h)
                w1_spec,                                       # W1 column block
                pl.BlockSpec((1, th), lambda i, h: (0, h)),   # b1 block
                w2_spec,                                       # W2 row block
                pl.BlockSpec((1, E), lambda i, h: (0, 0)),    # b2 (full)
            ],
            out_specs=pl.BlockSpec((tm, E), lambda i, h: (i, 0)),
            scratch_shapes=[pltpu.VMEM((tm, E), jnp.float32)],
        ),
        compiler_params=pltpu.CompilerParams(
            dimension_semantics=("parallel", "arbitrary"),
            vmem_limit_bytes=vmem_limit,
        ),
        cost_estimate=cost,
    )(x2, w1, b1_2, w2, b2_2)

    return out2.reshape(B, S, E)


def _reference(x, w1, b1, w2, b2):
    h = x @ w1 + b1
    g = 0.5 * h * (1.0 + jnp.tanh(_SQRT_2_OVER_PI * (h + 0.044715 * h ** 3)))
    return g @ w2 + b2


if __name__ == "__main__":
    # config.embedding = 32  -> hidden = 4 * 32 = 128
    B, S, E = 2, 8, 32
    H = 4 * E

    key = jax.random.PRNGKey(0)
    kx, kw1, kb1, kw2, kb2 = jax.random.split(key, 5)

    x = jax.random.normal(kx, (B, S, E), dtype=jnp.float32)
    # Deterministic init mimicking nn.Linear's uniform(-1/sqrt(fan_in), 1/sqrt(fan_in))
    w1 = jax.random.uniform(kw1, (E, H), jnp.float32, -1.0 / E ** 0.5, 1.0 / E ** 0.5)
    b1 = jax.random.uniform(kb1, (H,), jnp.float32, -1.0 / E ** 0.5, 1.0 / E ** 0.5)
    w2 = jax.random.uniform(kw2, (H, E), jnp.float32, -1.0 / H ** 0.5, 1.0 / H ** 0.5)
    b2 = jax.random.uniform(kb2, (E,), jnp.float32, -1.0 / H ** 0.5, 1.0 / H ** 0.5)

    out = transformer_feed_forward(x, w1, b1, w2, b2)
    out = jax.block_until_ready(out)

    ref = _reference(x, w1, b1, w2, b2)
    assert out.shape == (B, S, E)
    assert jnp.allclose(out, ref, atol=2e-5, rtol=2e-5), "mismatch vs reference"

    print("KERNEL_OK")
</pallas_src>

<mosaic_0001>
module attributes {stable_mosaic.version = 11 : i64} {
  func.func @_ffn_kernel(%arg0: i32, %arg1: i32, %arg2: memref<16x32xf32, #tpu.memory_space<vmem>>, %arg3: memref<32x128xf32, #tpu.memory_space<vmem>>, %arg4: memref<1x128xf32, #tpu.memory_space<vmem>>, %arg5: memref<128x32xf32, #tpu.memory_space<vmem>>, %arg6: memref<1x32xf32, #tpu.memory_space<vmem>>, %arg7: memref<16x32xf32, #tpu.memory_space<vmem>>, %arg8: memref<16x32xf32, #tpu.memory_space<vmem>>) attributes {dimension_semantics = [#tpu.dimension_semantics<parallel>, #tpu.dimension_semantics<arbitrary>], iteration_bounds = array<i64: 1, 1>, scalar_prefetch = 0 : i64, scratch_operands = 1 : i64, tpu.core_type = #tpu.core_type<tc>, window_params = [{transform_indices = @transform_0, window_bounds = array<i64: 16, 32>}, {transform_indices = @transform_1, window_bounds = array<i64: 32, 128>}, {transform_indices = @transform_2, window_bounds = array<i64: 1, 128>}, {transform_indices = @transform_3, window_bounds = array<i64: 128, 32>}, {pipeline_mode = #tpu.pipeline_mode<synchronous>, transform_indices = @transform_4, window_bounds = array<i64: 1, 32>}, {transform_indices = @transform_5, window_bounds = array<i64: 16, 32>}]} {
    %c0_i32 = arith.constant 0 : i32
    %0 = arith.cmpi eq, %arg1, %c0_i32 : i32
    %1 = arith.extui %0 : i1 to i32
    %c0_i32_0 = arith.constant 0 : i32
    %2 = arith.cmpi ne, %1, %c0_i32_0 : i32
    scf.if %2 {
      %cst_19 = arith.constant 0.000000e+00 : f32
      %30 = vector.broadcast %cst_19 : f32 to vector<16x32xf32>
      %c0_20 = arith.constant 0 : index
      %c0_21 = arith.constant 0 : index
      %31 = vector.load %arg8[%c0_20, %c0_21] : memref<16x32xf32, #tpu.memory_space<vmem>>, vector<16x32xf32>
      tpu.vector_store %arg8[%c0_20, %c0_21], %30 {strides = array<i32>} : memref<16x32xf32, #tpu.memory_space<vmem>>, vector<16x32xf32>,
    } else {
    }
    %c0 = arith.constant 0 : index
    %c0_1 = arith.constant 0 : index
    %3 = vector.load %arg2[%c0, %c0_1] : memref<16x32xf32, #tpu.memory_space<vmem>>, vector<16x32xf32>
    %c0_2 = arith.constant 0 : index
    %c0_3 = arith.constant 0 : index
    %4 = vector.load %arg3[%c0_2, %c0_3] : memref<32x128xf32, #tpu.memory_space<vmem>>, vector<32x128xf32>
    %cst = arith.constant dense<0.000000e+00> : vector<16x128xf32>
    %5 = tpu.matmul %3, %4, %cst {dimension_numbers = #tpu.dot_dimension_numbers<[1], [0], [0], [1], [0, 0, 1, 1], [], []>} : vector<16x32xf32>, vector<32x128xf32>, vector<16x128xf32> -> vector<16x128xf32>
    %c0_4 = arith.constant 0 : index
    %c0_5 = arith.constant 0 : index
    %6 = vector.load %arg4[%c0_4, %c0_5] : memref<1x128xf32, #tpu.memory_space<vmem>>, vector<1x128xf32>
    %7 = vector.broadcast %6 : vector<1x128xf32> to vector<16x128xf32>
    %8 = arith.addf %5, %7 : vector<16x128xf32>
    %cst_6 = arith.constant 5.000000e-01 : f32
    %9 = vector.broadcast %cst_6 : f32 to vector<16x128xf32>
    %10 = arith.mulf %9, %8 : vector<16x128xf32>
    %cst_7 = arith.constant 4.471500e-02 : f32
    %11 = vector.broadcast %cst_7 : f32 to vector<16x128xf32>
    %12 = arith.mulf %11, %8 : vector<16x128xf32>
    %13 = arith.mulf %12, %8 : vector<16x128xf32>
    %14 = arith.mulf %13, %8 : vector<16x128xf32>
    %15 = arith.addf %8, %14 : vector<16x128xf32>
    %cst_8 = arith.constant 0.797884583 : f32
    %16 = vector.broadcast %cst_8 : f32 to vector<16x128xf32>
    %17 = arith.mulf %16, %15 : vector<16x128xf32>
    %18 = math.tanh %17 : vector<16x128xf32>
    %cst_9 = arith.constant 1.000000e+00 : f32
    %19 = vector.broadcast %cst_9 : f32 to vector<16x128xf32>
    %20 = arith.addf %19, %18 : vector<16x128xf32>
    %21 = arith.mulf %10, %20 : vector<16x128xf32>
    %c0_10 = arith.constant 0 : index
    %c0_11 = arith.constant 0 : index
    %22 = vector.load %arg8[%c0_10, %c0_11] : memref<16x32xf32, #tpu.memory_space<vmem>>, vector<16x32xf32>
    %c0_12 = arith.constant 0 : index
    %c0_13 = arith.constant 0 : index
    %23 = vector.load %arg5[%c0_12, %c0_13] : memref<128x32xf32, #tpu.memory_space<vmem>>, vector<128x32xf32>
    %cst_14 = arith.constant dense<0.000000e+00> : vector<16x32xf32>
    %24 = tpu.matmul %21, %23, %cst_14 {dimension_numbers = #tpu.dot_dimension_numbers<[1], [0], [0], [1], [0, 0, 1, 1], [], []>} : vector<16x128xf32>, vector<128x32xf32>, vector<16x32xf32> -> vector<16x32xf32>
    %25 = arith.addf %22, %24 : vector<16x32xf32>
    %c0_15 = arith.constant 0 : index
    %c0_16 = arith.constant 0 : index
    %26 = vector.load %arg8[%c0_15, %c0_16] : memref<16x32xf32, #tpu.memory_space<vmem>>, vector<16x32xf32>
    tpu.vector_store %arg8[%c0_15, %c0_16], %25 {strides = array<i32>} : memref<16x32xf32, #tpu.memory_space<vmem>>, vector<16x32xf32>,
    %c0_i32_17 = arith.constant 0 : i32
    %27 = arith.cmpi eq, %arg1, %c0_i32_17 : i32
    %28 = arith.extui %27 : i1 to i32
    %c0_i32_18 = arith.constant 0 : i32
    %29 = arith.cmpi ne, %28, %c0_i32_18 : i32
    scf.if %29 {
      %c0_19 = arith.constant 0 : index
      %c0_20 = arith.constant 0 : index
      %30 = vector.load %arg8[%c0_19, %c0_20] : memref<16x32xf32, #tpu.memory_space<vmem>>, vector<16x32xf32>
      %c0_21 = arith.constant 0 : index
      %c0_22 = arith.constant 0 : index
      %31 = vector.load %arg6[%c0_21, %c0_22] : memref<1x32xf32, #tpu.memory_space<vmem>>, vector<1x32xf32>
      %32 = vector.broadcast %31 : vector<1x32xf32> to vector<16x32xf32>
      %33 = arith.addf %30, %32 : vector<16x32xf32>
      %c0_23 = arith.constant 0 : index
      %c0_24 = arith.constant 0 : index
      %34 = vector.load %arg7[%c0_23, %c0_24] : memref<16x32xf32, #tpu.memory_space<vmem>>, vector<16x32xf32>
      tpu.vector_store %arg7[%c0_23, %c0_24], %33 {strides = array<i32>} : memref<16x32xf32, #tpu.memory_space<vmem>>, vector<16x32xf32>,
    } else {
    }
    return
  }
  func.func @transform_0(%arg0: i32, %arg1: i32) -> (i32, i32) {
    %c0_i32 = arith.constant 0 : i32
    %c0_i32_0 = arith.constant 0 : i32
    return %arg0, %c0_i32 : i32, i32
  }
  func.func @transform_1(%arg0: i32, %arg1: i32) -> (i32, i32) {
    %c0_i32 = arith.constant 0 : i32
    %c0_i32_0 = arith.constant 0 : i32
    return %c0_i32, %arg1 : i32, i32
  }
  func.func @transform_2(%arg0: i32, %arg1: i32) -> (i32, i32) {
    %c0_i32 = arith.constant 0 : i32
    %c0_i32_0 = arith.constant 0 : i32
    return %c0_i32, %arg1 : i32, i32
  }
  func.func @transform_3(%arg0: i32, %arg1: i32) -> (i32, i32) {
    %c0_i32 = arith.constant 0 : i32
    %c0_i32_0 = arith.constant 0 : i32
    return %arg1, %c0_i32 : i32, i32
  }
  func.func @transform_4(%arg0: i32, %arg1: i32) -> (i32, i32) {
    %c0_i32 = arith.constant 0 : i32
    %c0_i32_0 = arith.constant 0 : i32
    %c0_i32_1 = arith.constant 0 : i32
    return %c0_i32, %c0_i32_0 : i32, i32
  }
  func.func @transform_5(%arg0: i32, %arg1: i32) -> (i32, i32) {
    %c0_i32 = arith.constant 0 : i32
    %c0_i32_0 = arith.constant 0 : i32
    return %arg0, %c0_i32 : i32, i32
  }
}

</mosaic_0001>

<bundles_post_ra>
// kernel: tpu_custom_call.1
= control target key start
LH: loop header
LB: loop body
LE: loop exit
PB: predicated region body
PF: predicated region fallthrough
CT: control target
= control target key end

     0   :  { %s333_s0 = inlined_call_operand.vmem [shape: f32[16,32], index: 0, kind: input, shape index: {}]   ;;  %s334_s1 = inlined_call_operand.vmem [shape: f32[32,128], index: 1, kind: input, shape index: {}]   ;;  %s335_s2 = inlined_call_operand.vmem [shape: f32[1,128], index: 2, kind: input, shape index: {}]   ;;  %s336_s3 = inlined_call_operand.vmem [shape: f32[128,32], index: 3, kind: input, shape index: {}]   ;;  %s337_s4 = inlined_call_operand.vmem [shape: f32[1,32], index: 4, kind: input, shape index: {}]   ;;  %s338_s5 = inlined_call_operand.hbm [shape: f32[16,32], index: 5, kind: output, shape index: {}]  }
   0x1   :  { %v33_v0 = vld [vmem:[%s334_s1 + $0x18] sm:$0xff]  ;;  %v32_v1 = vld [vmem:[%s334_s1 + $0x10] sm:$0xff]  ;;  %v31_v2 = vld [vmem:[%s334_s1 + $0x8] sm:$0xff] }
   0x2   :  { %57 = vmatpush.msra.mxu0 %v33_v0  ;;  %v103_v3 = vld [vmem:[%s336_s3 + $0x78] sm:$0xff]  ;;  %v102_v4 = vld [vmem:[%s336_s3 + $0x70] sm:$0xff]  ;;  %v30_v5 = vld [vmem:[%s334_s1] sm:$0xff] }
   0x3   :  { %104 = vmatpush.msra.mxu1 %v103_v3  ;;  %v101_v6 = vld [vmem:[%s336_s3 + $0x68] sm:$0xff]  ;;  %164 = vmatpush.msra.mxu2 %v103_v3 }
   0x4   :  { %58 = vmatpush.msra.mxu0 %v32_v1 }
   0x5   :  { %10 = vsyncpa [#allocation4], 0  ;;  %vm25_vm0 = vcmask 261120   ;;  %v28_v7 = vld [vmem:[%s333_s0] sm:$0xff]  ;;  %105 = vmatpush.msra.mxu1 %v102_v4  ;;  %165 = vmatpush.msra.mxu2 %v102_v4  ;;  %v29_v9 = vld [vmem:[%s333_s0 + $0x8] sm:$0xff]  ;;  %v216_v25 = vmov 0.0  }
   0x6   :  { %59 = vmatpush.msra.mxu0 %v31_v2  ;;  %v100_v8 = vld [vmem:[%s336_s3 + $0x60] sm:$0xff]  ;;  %v99_v10 = vld [vmem:[%s336_s3 + $0x58] sm:$0xff]  ;;  %v98_v11 = vld [vmem:[%s336_s3 + $0x50] sm:$0xff]  ;;  %26 = vst.msk [vmem:[#allocation2] sm:$0xff] %vm25_vm0, %v216_v25  ;;  %s217_s11 = smov [#allocation3]   ;;  %s150_s15 = sshll.u32 %s338_s5, 4  ;;  %s151_s15 = int_to_ptr.hbm [resolvable:$true] %s150_s15 }
   0x7   :  { %106 = vmatpush.msra.mxu1 %v101_v6  ;;  %166 = vmatpush.msra.mxu2 %v101_v6  ;;  %v97_v12 = vld [vmem:[%s336_s3 + $0x48] sm:$0xff]  ;;  %v96_v13 = vld [vmem:[%s336_s3 + $0x40] sm:$0xff]  ;;  %v95_v14 = vld [vmem:[%s336_s3 + $0x38] sm:$0xff]  ;;  %27 = vst.msk [vmem:[#allocation2 + $0x8] sm:$0xff] %vm25_vm0, %v216_v25  ;;  %s148_s12 = sshll.u32 %s217_s11, 4  ;;  %s219_s16 = smov 8   ;;  %s149_s12 = int_to_ptr.vmem [resolvable:$true] %s148_s12 }
   0x8   :  { %60 = vmatpush.msra.mxu0 %v30_v5  ;;  %v94_v15 = vld [vmem:[%s336_s3 + $0x30] sm:$0xff]  ;;  %v93_v16 = vld [vmem:[%s336_s3 + $0x28] sm:$0xff]  ;;  %v92_v17 = vld [vmem:[%s336_s3 + $0x20] sm:$0xff] }
   0x9   :  { %162 = vmatmul.msk.f32.vlgmr.msra.gmra.mxu0 %vm25_vm0, %v28_v7  ;;  %107 = vmatpush.msra.mxu1 %v100_v8  ;;  %v91_v18 = vld [vmem:[%s336_s3 + $0x18] sm:$0xff]  ;;  %v90_v19 = vld [vmem:[%s336_s3 + $0x10] sm:$0xff]  ;;  %v89_v20 = vld [vmem:[%s336_s3 + $0x8] sm:$0xff] }
   0xa   :  { %167 = vmatpush.msra.mxu2 %v100_v8  ;;  %v88_v21 = vld [vmem:[%s336_s3] sm:$0xff] }
   0xb   :  { %108 = vmatpush.msra.mxu1 %v99_v10  ;;  %v184_v22 = vld [vmem:[%s335_s2] ss:$0 sm:$0xff] }
   0xc   :  { %168 = vmatpush.msra.mxu2 %v99_v10  ;;  %v185_v49 = vld [vmem:[%s337_s4] ss:$0 sm:$0xff]  ;;  %s218_s4 = smov 128  }
   0xd   :  { %109 = vmatpush.msra.mxu1 %v98_v11  ;;  %v86_v46 = vld [vmem:[#allocation2] sm:$0xff] }
   0xe   :  { %169 = vmatpush.msra.mxu2 %v98_v11  ;;  %v87_v52 = vld [vmem:[#allocation2 + $0x8] sm:$0xff] }
   0xf   :  { %110 = vmatpush.msra.mxu1 %v97_v12 }
  0x10   :  { %170 = vmatpush.msra.mxu2 %v97_v12 }
  0x11   :  { %163 = vmatmul.msk.f32.gmra.mxu0 %vm25_vm0, %v29_v9  ;;  %111 = vmatpush.msra.mxu1 %v96_v13 }
  0x12   :  { %171 = vmatpush.msra.mxu2 %v96_v13 }
  0x13   :  { %112 = vmatpush.msra.mxu1 %v95_v14 }
  0x14   :  { %172 = vmatpush.msra.mxu2 %v95_v14 }
  0x15   :  { %113 = vmatpush.msra.mxu1 %v94_v15 }
  0x16   :  { %173 = vmatpush.msra.mxu2 %v94_v15 }
  0x17   :  { %114 = vmatpush.msra.mxu1 %v93_v16 }
  0x18   :  { %174 = vmatpush.msra.mxu2 %v93_v16 }
  0x19   :  { %115 = vmatpush.msra.mxu1 %v92_v17 }
  0x1a   :  { %175 = vmatpush.msra.mxu2 %v92_v17 }
  0x1b   :  { %116 = vmatpush.msra.mxu1 %v91_v18 }
  0x1c   :  { %176 = vmatpush.msra.mxu2 %v91_v18 }
  0x1d   :  { %117 = vmatpush.msra.mxu1 %v90_v19 }
  0x1e   :  { %177 = vmatpush.msra.mxu2 %v90_v19 }
  0x1f   :  { %118 = vmatpush.msra.mxu1 %v89_v20 }
  0x20   :  { %178 = vmatpush.msra.mxu2 %v89_v20 }
  0x21   :  { %119 = vmatpush.msra.mxu1 %v88_v21 }
  0x22   :  { %179 = vmatpush.msra.mxu2 %v88_v21 }
  0x86   :  { %v62_v23 = vpop.f32.mrf.mxu0 }
  0x87   :  { %v63_v24 = vadd.f32 %v184_v22, %v62_v23 }
  0x89   :  { %v70_v26 = vmul.f32 0.044715, %v63_v24  ;;  %v68_v39 = vmul.f32 0.5, %v63_v24 }
  0x8b   :  { %v72_v27 = vmul.f32 %v70_v26, %v63_v24 }
  0x8d   :  { %v74_v28 = vmul.f32 %v72_v27, %v63_v24 }
  0x8e   :  { %v65_v29 = vpop.f32.mrf.mxu0 }
  0x8f   :  { %v66_v30 = vadd.f32 %v184_v22, %v65_v29  ;;  %v76_v31 = vadd.f32 %v74_v28, %v63_v24 }
  0x91   :  { %v78_v32 = vmul.f32 0.7978846, %v76_v31  ;;  %v71_v33 = vmul.f32 0.044715, %v66_v30  ;;  %v69_v43 = vmul.f32 0.5, %v66_v30 }
  0x93   :  { %186 = vtanh.f32 %v78_v32  ;;  %v73_v34 = vmul.f32 %v71_v33, %v66_v30 }
  0x95   :  { %v75_v35 = vmul.f32 %v73_v34, %v66_v30 }
  0x97   :  { %v77_v36 = vadd.f32 %v75_v35, %v66_v30 }
  0x99   :  { %v187_v37 = vpop.eup %186  ;;  %v79_v38 = vmul.f32 0.7978846, %v77_v36 }
  0x9a   :  { %v82_v40 = vadd.f32 1.0, %v187_v37 }
  0x9b   :  { %188 = vtanh.f32 %v79_v38 }
  0x9c   :  { %v84_v41 = vmul.f32 %v82_v40, %v68_v39 }
  0x9e   :  { %120 = vmatmul.f32.vlgmr.msra.gmra.mxu1 %v84_v41 }
  0xa1   :  { %v189_v42 = vpop.eup %188 }
  0xa2   :  { %v83_v44 = vadd.f32 1.0, %v189_v42 }
  0xa4   :  { %v85_v45 = vmul.f32 %v83_v44, %v69_v43 }
  0xa6   :  { %123 = vmatmul.f32.vlgmr.msra.gmra.mxu2 %v85_v45 }
 0x11b   :  { %v121_v47 = vpop.f32.mrf.mxu1 }
 0x11c   :  { %v127_v48 = vadd.f32 %v121_v47, %v86_v46 }
 0x11e   :  { %129 = vst.msk [vmem:[#allocation2] sm:$0xff] %vm25_vm0, %v127_v48 }
 0x125   :  { %v134_v50 = vld [vmem:[#allocation2] sm:$0xff] }
 0x126   :  { %v140_v51 = vadd.f32 %v185_v49, %v134_v50 }
 0x128   :  { %142 = vst.msk [vmem:[#allocation3] sm:$0xff] %vm25_vm0, %v140_v51 }
 0x129   :  { %v124_v53 = vpop.f32.mrf.mxu2 }
 0x12a   :  { %v128_v54 = vadd.f32 %v124_v53, %v87_v52 }
 0x12c   :  { %130 = vst.msk [vmem:[#allocation2 + $0x8] sm:$0xff] %vm25_vm0, %v128_v54 }
 0x133   :  { %v135_v55 = vld [vmem:[#allocation2 + $0x8] sm:$0xff] }
 0x134   :  { %v141_v56 = vadd.f32 %v185_v49, %v135_v55 }
 0x136   :  { %143 = vst.msk [vmem:[#allocation3 + $0x8] sm:$0xff] %vm25_vm0, %v141_v56 }
 0x137   :  { %156 = dma.vmem_to_hbm [thread:$0]  %s149_s12, 256, %s151_s15, [#allocation4], %s218_s4, %s218_s4, %s219_s16  }
 0x138   :  { %214 = dma.done.wait [#allocation4], 256  }
 0x139   :  { %215 = vsyncadd [#allocation4], 4294967040 }
 0x13a   :  { %161 = vsyncpa [#allocation4], 1 }

</bundles_post_ra>
